<compile_context>
chip_gen: v7x
topology: tpu7x:2x2x1
jax: 0.10.0
libtpu: 0.0.40
codegen_flags: <defaults>
</compile_context>

<pallas_src>
import functools

import jax
import jax.numpy as jnp
from jax import lax
from jax.experimental import pallas as pl
from jax.experimental.pallas import tpu as pltpu

_LANES = 128      # vreg lane width
_SUBLANES = 8     # vreg sublane count (f32)


def _round_up(v, m):
    return ((v + m - 1) // m) * m


# ----------------------------------------------------------------------------
# Fast path: in_features == out_features == 1  ->  y = w * x + b  (pure VPU)
# ----------------------------------------------------------------------------
def _scale_bias_kernel(w_ref, b_ref, x_ref, o_ref):
    """w_ref, b_ref: (1,) scalars in SMEM.
    x_ref, o_ref: (row_tile, 128) lane-dense f32 tiles in VMEM."""
    o_ref[...] = x_ref[...] * w_ref[0] + b_ref[0]


# ----------------------------------------------------------------------------
# General path: tiled MXU matmul with K-reduction accumulator
# ----------------------------------------------------------------------------
def _linear_kernel(x_ref, wt_ref, b_ref, o_ref, acc_ref, *,
                   n_k, tile_k, in_f, ragged_k):
    """One (batch_tile, out_tile) output block; grid axis 2 reduces over K.

    x_ref : (tile_n, tile_k)   VMEM
    wt_ref: (tile_k, tile_out) VMEM   (weight already transposed in wrapper)
    b_ref : (1, tile_out)      VMEM
    o_ref : (tile_n, tile_out) VMEM   (written only on the last K step)
    acc_ref: (tile_n, tile_out) f32 scratch accumulator
    """
    k = pl.program_id(2)

    @pl.when(k == 0)
    def _init():
        acc_ref[...] = jnp.zeros_like(acc_ref)

    x_blk = x_ref[...]
    wt_blk = wt_ref[...]
    if ragged_k:
        # Last K block overhangs in_f: out-of-bounds reads are unspecified,
        # so zero both operands in the invalid K range (cheap VPU work,
        # statically compiled in only when in_f % tile_k != 0).
        base = k * tile_k
        col = lax.broadcasted_iota(jnp.int32, x_blk.shape, 1) + base
        x_blk = jnp.where(col < in_f, x_blk, 0.0)
        row = lax.broadcasted_iota(jnp.int32, wt_blk.shape, 0) + base
        wt_blk = jnp.where(row < in_f, wt_blk, 0.0)

    acc_ref[...] += jnp.dot(x_blk, wt_blk, preferred_element_type=jnp.float32)

    @pl.when(k == n_k - 1)
    def _finish():
        o_ref[...] = (acc_ref[...] + b_ref[...]).astype(o_ref.dtype)


# ----------------------------------------------------------------------------
# Wrapper: Pallas equivalent of LR.forward (nn.Linear(input_size, output_size))
# ----------------------------------------------------------------------------
def lr_forward(x, weight, bias):
    """x: (N, in_f) f32, weight: (out_f, in_f) f32 (PyTorch layout),
    bias: (out_f,) f32 -> (N, out_f) f32."""
    n, in_f = x.shape
    out_f, in_f_w = weight.shape
    assert in_f == in_f_w, "weight / input feature mismatch"
    assert bias.shape == (out_f,)

    if in_f == 1 and out_f == 1:
        # ---- 1x1 linear: lane-dense VPU broadcast, scalars in SMEM --------
        slab = _SUBLANES * _LANES                      # 1024: full (8,128) vregs
        n_pad = _round_up(n, slab)
        rows = n_pad // _LANES                         # multiple of 8
        # One small pad+reshape pass over x (N*4 bytes); the padded lanes just
        # evaluate to the bias value and are sliced off below — never reduced
        # or written back unsliced.
        x_slab = jnp.pad(x.reshape(-1), (0, n_pad - n)).reshape(rows, _LANES)

        row_tile = min(512, rows)                      # 512x128 f32 = 256 KiB/buf
        grid = (pl.cdiv(rows, row_tile),)

        out_slab = pl.pallas_call(
            _scale_bias_kernel,
            out_shape=jax.ShapeDtypeStruct((rows, _LANES), x.dtype),
            grid=grid,
            in_specs=[
                pl.BlockSpec(memory_space=pltpu.MemorySpace.SMEM),  # w scalar
                pl.BlockSpec(memory_space=pltpu.MemorySpace.SMEM),  # b scalar
                pl.BlockSpec((row_tile, _LANES), lambda i: (i, 0)),
            ],
            out_specs=pl.BlockSpec((row_tile, _LANES), lambda i: (i, 0)),
            compiler_params=pltpu.CompilerParams(
                dimension_semantics=("parallel",)),
        )(weight.reshape(1), bias.reshape(1), x_slab)

        return out_slab.reshape(-1)[:n].reshape(n, 1)

    # ---- general linear: 3-D tiled MXU matmul --------------------------------
    # Tile caps chosen so the double-buffered working set
    #   2*(tile_n*tile_k) + 2*(tile_k*tile_out) + tile_n*tile_out (acc)
    #   + 2*(tile_n*tile_out)  (f32)
    # stays ~4.5 MiB at the caps below — under v5e's 16 MiB scoped default and
    # far under v7x's 64 MiB physical VMEM, while keeping 512-wide tiles for
    # HBM-roofline efficiency.
    TILE_N_CAP, TILE_K_CAP, TILE_OUT_CAP = 512, 512, 256

    if n <= _SUBLANES:
        tile_n = n                                   # equal-to-full-dim block
    elif n <= 2 * TILE_N_CAP:
        # >= 2 batch steps so v7x megacore has work for both TensorCores.
        tile_n = _round_up(pl.cdiv(n, 2), _SUBLANES)
    else:
        tile_n = TILE_N_CAP

    tile_k = in_f if in_f <= TILE_K_CAP else TILE_K_CAP      # 512 % 128 == 0
    tile_out = out_f if out_f <= TILE_OUT_CAP else TILE_OUT_CAP  # 256 % 128 == 0

    grid = (pl.cdiv(n, tile_n), pl.cdiv(out_f, tile_out), pl.cdiv(in_f, tile_k))
    n_k = grid[2]
    ragged_k = (in_f % tile_k) != 0

    wt = weight.T                     # one-time HBM pass over W: (in_f, out_f)
    b2 = bias.reshape(1, out_f)

    kernel = functools.partial(_linear_kernel, n_k=n_k, tile_k=tile_k,
                               in_f=in_f, ragged_k=ragged_k)

    flops = 2 * n * in_f * out_f
    bytes_accessed = 4 * (n * in_f + in_f * out_f + out_f + n * out_f)

    out = pl.pallas_call(
        kernel,
        out_shape=jax.ShapeDtypeStruct((n, out_f), x.dtype),
        grid=grid,
        in_specs=[
            pl.BlockSpec((tile_n, tile_k), lambda i, j, k: (i, k)),
            pl.BlockSpec((tile_k, tile_out), lambda i, j, k: (k, j)),
            pl.BlockSpec((1, tile_out), lambda i, j, k: (0, j)),
        ],
        out_specs=pl.BlockSpec((tile_n, tile_out), lambda i, j, k: (i, j)),
        scratch_shapes=[pltpu.VMEM((tile_n, tile_out), jnp.float32)],
        compiler_params=pltpu.CompilerParams(
            dimension_semantics=("parallel", "parallel", "arbitrary"),
            vmem_limit_bytes=32 * 1024 * 1024),
        cost_estimate=pl.CostEstimate(flops=flops,
                                      bytes_accessed=bytes_accessed,
                                      transcendentals=0),
    )(x, wt, b2)

    return out


if __name__ == "__main__":
    key = jax.random.PRNGKey(0)
    keys = jax.random.split(key, 9)

    # --- Case 1: exactly what the source script builds: LR(1, 1) driven by
    #     x = torch.randn(100, 1) * 10  -> fast lane-dense VPU path.
    batch, in_f, out_f = 100, 1, 1
    bound = 1.0 / (in_f ** 0.5)                  # nn.Linear default init range
    w1 = jax.random.uniform(keys[0], (out_f, in_f), jnp.float32, -bound, bound)
    b1 = jax.random.uniform(keys[1], (out_f,), jnp.float32, -bound, bound)
    x1 = jax.random.normal(keys[2], (batch, in_f), jnp.float32) * 10.0

    pred1 = lr_forward(x1, w1, b1)
    jax.block_until_ready(pred1)
    ref1 = x1 @ w1.T + b1
    assert pred1.shape == (batch, out_f)
    assert jnp.allclose(pred1, ref1, atol=1e-5, rtol=1e-5)

    # --- Case 2: small non-trivial size -> general (MXU, tiled) path with a
    #     ragged final batch block handled by grid clipping (no wrapper pad).
    in_f2, out_f2 = 32, 8
    bound2 = 1.0 / (in_f2 ** 0.5)
    w2 = jax.random.uniform(keys[3], (out_f2, in_f2), jnp.float32, -bound2, bound2)
    b2 = jax.random.uniform(keys[4], (out_f2,), jnp.float32, -bound2, bound2)
    x2 = jax.random.normal(keys[5], (batch, in_f2), jnp.float32)

    pred2 = lr_forward(x2, w2, b2)
    jax.block_until_ready(pred2)
    ref2 = x2 @ w2.T + b2
    assert pred2.shape == (batch, out_f2)
    assert jnp.allclose(pred2, ref2, atol=1e-4, rtol=1e-4)

    # --- Case 3: exercise the K-reduction grid axis with a ragged final K
    #     block (in-kernel iota/where masking) and accumulator init/finalize.
    n3, in_f3, out_f3 = 64, 520, 200
    bound3 = 1.0 / (in_f3 ** 0.5)
    w3 = jax.random.uniform(keys[6], (out_f3, in_f3), jnp.float32, -bound3, bound3)
    b3 = jax.random.uniform(keys[7], (out_f3,), jnp.float32, -bound3, bound3)
    x3 = jax.random.normal(keys[8], (n3, in_f3), jnp.float32)

    pred3 = lr_forward(x3, w3, b3)
    jax.block_until_ready(pred3)
    ref3 = x3 @ w3.T + b3
    assert pred3.shape == (n3, out_f3)
    assert jnp.allclose(pred3, ref3, atol=1e-4, rtol=1e-4)

    print("KERNEL_OK")
</pallas_src>

<mosaic_0001>
module attributes {stable_mosaic.version = 11 : i64} {
  func.func @_scale_bias_kernel(%arg0: i32, %arg1: memref<1xf32, #tpu.memory_space<smem>>, %arg2: memref<1xf32, #tpu.memory_space<smem>>, %arg3: memref<8x128xf32, #tpu.memory_space<vmem>>, %arg4: memref<8x128xf32, #tpu.memory_space<vmem>>) attributes {dimension_semantics = [#tpu.dimension_semantics<parallel>], iteration_bounds = array<i64: 1>, scalar_prefetch = 0 : i64, scratch_operands = 0 : i64, tpu.core_type = #tpu.core_type<tc>, window_params = [{transform_indices = @transform_0, window_bounds = array<i64: 1>}, {transform_indices = @transform_1, window_bounds = array<i64: 1>}, {transform_indices = @transform_2, window_bounds = array<i64: 8, 128>}, {transform_indices = @transform_3, window_bounds = array<i64: 8, 128>}]} {
    %c0 = arith.constant 0 : index
    %c0_0 = arith.constant 0 : index
    %0 = vector.load %arg3[%c0, %c0_0] : memref<8x128xf32, #tpu.memory_space<vmem>>, vector<8x128xf32>
    %c0_1 = arith.constant 0 : index
    %1 = memref.load %arg1[%c0_1] : memref<1xf32, #tpu.memory_space<smem>>
    %2 = vector.broadcast %1 : f32 to vector<8x128xf32>
    %3 = arith.mulf %0, %2 : vector<8x128xf32>
    %c0_2 = arith.constant 0 : index
    %4 = memref.load %arg2[%c0_2] : memref<1xf32, #tpu.memory_space<smem>>
    %5 = vector.broadcast %4 : f32 to vector<8x128xf32>
    %6 = arith.addf %3, %5 : vector<8x128xf32>
    %c0_3 = arith.constant 0 : index
    %c0_4 = arith.constant 0 : index
    %7 = vector.load %arg4[%c0_3, %c0_4] : memref<8x128xf32, #tpu.memory_space<vmem>>, vector<8x128xf32>
    tpu.vector_store %arg4[%c0_3, %c0_4], %6 {strides = array<i32>} : memref<8x128xf32, #tpu.memory_space<vmem>>, vector<8x128xf32>,
    return
  }
  func.func @transform_0(%arg0: i32) -> i32 {
    %c0_i32 = arith.constant 0 : i32
    %c0_i32_0 = arith.constant 0 : i32
    return %c0_i32 : i32
  }
  func.func @transform_1(%arg0: i32) -> i32 {
    %c0_i32 = arith.constant 0 : i32
    %c0_i32_0 = arith.constant 0 : i32
    return %c0_i32 : i32
  }
  func.func @transform_2(%arg0: i32) -> (i32, i32) {
    %c0_i32 = arith.constant 0 : i32
    %c0_i32_0 = arith.constant 0 : i32
    return %arg0, %c0_i32 : i32, i32
  }
  func.func @transform_3(%arg0: i32) -> (i32, i32) {
    %c0_i32 = arith.constant 0 : i32
    %c0_i32_0 = arith.constant 0 : i32
    return %arg0, %c0_i32 : i32, i32
  }
}

</mosaic_0001>

<bundles_post_ra>
// kernel: tpu_custom_call.1
= control target key start
LH: loop header
LB: loop body
LE: loop exit
PB: predicated region body
PF: predicated region fallthrough
CT: control target
= control target key end

     0   :  { %10 = vsyncpa [#allocation5], 0  ;;  %s154_s0 = inlined_call_operand.<no memory space> [shape: f32[1], index: 0, kind: input, shape index: {}]   ;;  %s155_s1 = inlined_call_operand.<no memory space> [shape: f32[1], index: 1, kind: input, shape index: {}]   ;;  %s156_s2 = inlined_call_operand.hbm [shape: f32[8,128], index: 2, kind: input, shape index: {}]   ;;  %s157_s3 = inlined_call_operand.hbm [shape: f32[8,128], index: 3, kind: output, shape index: {}]  }
   0x1   :  { %11 = vsyncpa [#allocation6], 0  ;;  %s102_s12 = smov [#allocation4]   ;;  %s54_s16 = scalar_lea.hbm %s156_s2, 128 }
   0x2   :  { %s22_s13 = sshll.u32 %s102_s12, 4  ;;  %p55_p0 = scmp.ne.s32.totalorder %s156_s2, %s54_s16  ;;  %s23_s13 = int_to_ptr.vmem [resolvable:$true] %s22_s13 }
   0x3   :  { %p58_p1 = scmp.lt.u32.totalorder %s54_s16, %s156_s2 }
   0x5   :  { %p60_p2 = pnand %p58_p1, %p55_p0 }
   0x7   :  { %63 = shalt.err (!%p60_p2)
}
   0x8   :  { %s64_s21 = scalar_lea.vmem %s23_s13, 128  ;;  %p69_p4 = scmp.lt.s32.totalorder %s23_s13, %s23_s13 }
   0x9   :  { %p65_p3 = scmp.ne.s32.totalorder %s23_s13, %s64_s21  ;;  %p70_p5 = scmp.lt.s32.totalorder %s64_s21, %s64_s21 }
   0xb   :  { %p71_p6 = por %p70_p5, %p69_p4 }
   0xd   :  { %p72_p7 = pnand %p71_p6, %p65_p3 }
   0xf   :  { %75 = shalt.err (!%p72_p7)
}
  0x10   :  { %25 = dma.hbm_to_vmem [thread:$0]  %s156_s2, 128, %s23_s13, [#allocation5]  }
  0x11   :  { %98 = dma.done.wait [#allocation5], 128  }
  0x12   :  { %99 = vsyncadd [#allocation5], 4294967168  ;;  %v31_v0 = vstv %s154_s0  ;;  %v29_v1 = vld [vmem:[#allocation4] sm:$0xff]  ;;  %v34_v2 = vstv %s155_s1  ;;  %s103_s28 = smov [#allocation7]  }
  0x13   :  { %s43_s29 = sshll.u32 %s103_s28, 4  ;;  %v32_v3 = vmul.f32 %v31_v0, %v29_v1  ;;  %s44_s29 = int_to_ptr.vmem [resolvable:$true] %s43_s29 }
  0x14   :  { %s76_s30 = scalar_lea.vmem %s44_s29, 128  ;;  %p81_p9 = scmp.lt.s32.totalorder %s44_s29, %s44_s29 }
  0x15   :  { %v35_v4 = vadd.f32 %v34_v2, %v32_v3  ;;  %p77_p8 = scmp.ne.s32.totalorder %s44_s29, %s76_s30  ;;  %p82_p10 = scmp.lt.s32.totalorder %s76_s30, %s76_s30 }
  0x17   :  { %36 = vst [vmem:[#allocation7] sm:$0xff] %v35_v4  ;;  %p83_p11 = por %p82_p10, %p81_p9 }
  0x19   :  { %p84_p12 = pnand %p83_p11, %p77_p8 }
  0x1b   :  { %87 = shalt.err (!%p84_p12)
}
  0x1c   :  { %s88_s4 = scalar_lea.hbm %s157_s3, 128 }
  0x1d   :  { %p89_p13 = scmp.ne.s32.totalorder %s157_s3, %s88_s4  ;;  %p92_p0 = scmp.lt.u32.totalorder %s88_s4, %s157_s3 }
  0x1f   :  { %p94_p1 = pnand %p92_p0, %p89_p13 }
  0x21   :  { %97 = shalt.err (!%p94_p1)
}
  0x22   :  { %46 = dma.vmem_to_hbm [thread:$0]  %s44_s29, 128, %s157_s3, [#allocation6]  }
  0x23   :  { %100 = dma.done.wait [#allocation6], 128  }
  0x24   :  { %101 = vsyncadd [#allocation6], 4294967168 }
  0x25   :  { %50 = vsyncpa [#allocation5], 1 }
  0x26   :  { %51 = vsyncpa [#allocation6], 1 }

</bundles_post_ra>
